<compile_context>
chip_gen: v5e
topology: v5e:2x2
jax: 0.10.0
libtpu: 0.0.40
codegen_flags: <defaults>
</compile_context>

<pallas_src>
import functools
import numpy as np
import jax
import jax.numpy as jnp
from jax.experimental import pallas as pl
from jax.experimental.pallas import tpu as pltpu


def _round_up(x, m):
    return (x + m - 1) // m * m


# fixed binary taps from the module's constructor (Conv1d weight layout (1,1,5))
_ABCDE = np.array([1., 1., 1., 1., 1.], np.float32)
_ABCE = np.array([1., 1., 1., 0., 1.], np.float32)
_BDE = np.array([0., 1., 0., 1., 1.], np.float32)


# ----------------------------- Pallas kernel --------------------------------

def _fused_encode_kernel(x_ref, w_ref, b_ref, o_ref):
    # (tm, Lp) @ (Lp, 3*Lp) on the MXU, bf16 operands, f32 accumulation.
    acc = jnp.dot(x_ref[...], w_ref[...], preferred_element_type=jnp.float32)
    acc = acc + b_ref[...]                       # +1 on the blk1 lanes
    # torch `%` is floor-mod; operands are exact small integers here.
    y = acc - 2.0 * jnp.floor(acc * 0.5)
    o_ref[...] = 2.0 * y - 1.0                   # codes = 2 * (x_tx % 2) - 1


@functools.partial(jax.jit, static_argnames=("tm",))
def _run_fused(x_pad, w_big, bias, tm):
    Bp, Lp = x_pad.shape
    Cp = w_big.shape[1]
    flops = 2 * Bp * Lp * Cp
    bytes_accessed = (x_pad.size * 2 + w_big.size * 2
                      + bias.size * 4 + Bp * Cp * 4)
    return pl.pallas_call(
        _fused_encode_kernel,
        out_shape=jax.ShapeDtypeStruct((Bp, Cp), jnp.float32),
        grid=(Bp // tm,),
        in_specs=[
            pl.BlockSpec((tm, Lp), lambda i: (i, 0)),   # batch tile (pipelined)
            pl.BlockSpec((Lp, Cp), lambda i: (0, 0)),   # resident fused weights
            pl.BlockSpec((1, Cp), lambda i: (0, 0)),    # resident bias row
        ],
        out_specs=pl.BlockSpec((tm, Cp), lambda i: (i, 0)),
        compiler_params=pltpu.CompilerParams(
            dimension_semantics=("parallel",),          # megacore split on v7x
            vmem_limit_bytes=64 * 1024 * 1024),
        cost_estimate=pl.CostEstimate(
            flops=int(flops), transcendentals=0,
            bytes_accessed=int(bytes_accessed)),
    )(x_pad, w_big, bias)


# ------------------------------- JAX glue ------------------------------------

def _band_matrix(w, L):
    """(L, L) matrix M s.t. (x @ M)[:, j] == Conv1d(x, w, padding=K//2)[:, j]."""
    K = w.shape[0]
    i = np.arange(L)[:, None]
    j = np.arange(L)[None, :]
    k = i - j + K // 2
    valid = (k >= 0) & (k < K)
    return np.where(valid, w[np.clip(k, 0, K - 1)], 0.0).astype(np.float32)


def build_encoder_tables(p_array, block_len):
    """Fold the 3 convs, the interleaver and the +1 into one lane-dense table."""
    L = block_len
    Lp = _round_up(L, 128)
    Cp = 3 * Lp                                   # output lanes, multiple of 128
    m1 = _band_matrix(_ABCDE, L)
    m2 = _band_matrix(_ABCE, L)
    # blk3 = conv_bde(x[:, p]); fold the permutation into the band matrix:
    m3 = np.zeros((L, L), np.float32)
    m3[np.asarray(p_array)] = _band_matrix(_BDE, L)
    w_big = np.zeros((Lp, Cp), np.float32)
    bias = np.zeros((1, Cp), np.float32)
    cols = 3 * np.arange(L)                       # interleave channels per position
    w_big[:L, cols + 0] = m1
    w_big[:L, cols + 1] = m2
    w_big[:L, cols + 2] = m3
    bias[0, cols + 0] = 1.0                       # blk1 = abcde(x) + 1
    return jnp.asarray(w_big, jnp.bfloat16), jnp.asarray(bias, jnp.float32)


def turboae_encode(inputs, p_array, *, boundary_approx=False):
    """inputs: (B, block_len, 1) float bits in {0,1} -> codes (B, block_len, 3)."""
    if boundary_approx:
        # TODO(synk): boundaryApprox=True edge-correction branch (c/ace convs on
        # positions 0:2 and 98:100) not implemented; constructor default is False.
        raise NotImplementedError("boundaryApprox=True path not implemented")
    B, L, K = inputs.shape
    assert K == 1
    w_big, bias = build_encoder_tables(p_array, L)
    Lp, Cp = w_big.shape
    Bp = _round_up(B, 8)
    tm = min(Bp, 256)                             # batch tile, multiple of 8
    Bp = _round_up(Bp, tm)
    x_pad = jnp.zeros((Bp, Lp), jnp.bfloat16)
    x_pad = x_pad.at[:B, :L].set(inputs[..., 0].astype(jnp.bfloat16))
    out = _run_fused(x_pad, w_big, bias, tm)      # (Bp, 3*Lp), lane-dense stores
    return out.reshape(Bp, Lp, 3)[:B, :L, :]


# --------------------------- pure-JAX reference ------------------------------

def _conv1d_same_ref(x, w):
    K = w.shape[0]
    pad = K // 2
    L = x.shape[1]
    xp = jnp.pad(x, ((0, 0), (pad, pad)))
    return sum(w[k] * xp[:, k:k + L] for k in range(K))


def ref_forward(inputs, p_array):
    x = inputs[..., 0].astype(jnp.float32)
    blk1 = _conv1d_same_ref(x, jnp.asarray(_ABCDE)) + 1.0
    blk2 = _conv1d_same_ref(x, jnp.asarray(_ABCE))
    x_int = jnp.take(x, jnp.asarray(p_array), axis=1)      # interleaver
    blk3 = _conv1d_same_ref(x_int, jnp.asarray(_BDE))
    x_tx = jnp.mod(jnp.stack([blk1, blk2, blk3], axis=-1), 2.0)
    return 2.0 * x_tx - 1.0


# --------------------------------- main --------------------------------------

if __name__ == "__main__":
    batch = 4
    block_len = 100      # matches the module's 0:2 / 98:100 boundary indexing
    key = jax.random.PRNGKey(0)
    k_bits, k_perm = jax.random.split(key)
    inputs = jax.random.bernoulli(
        k_bits, 0.5, (batch, block_len, 1)).astype(jnp.float32)
    p_array = np.asarray(jax.random.permutation(k_perm, block_len))

    codes = turboae_encode(inputs, p_array)
    codes = jax.block_until_ready(codes)

    ref = ref_forward(inputs, p_array)
    assert codes.shape == (batch, block_len, 3)
    assert bool(jnp.allclose(codes, ref, atol=1e-5, rtol=1e-5))
    print("KERNEL_OK")
</pallas_src>

<mosaic_0001>
module attributes {stable_mosaic.version = 11 : i64} {
  func.func @_fused_encode_kernel(%arg0: i32, %arg1: memref<8x128xbf16, #tpu.memory_space<vmem>>, %arg2: memref<128x384xbf16, #tpu.memory_space<vmem>>, %arg3: memref<1x384xf32, #tpu.memory_space<vmem>>, %arg4: memref<8x384xf32, #tpu.memory_space<vmem>>) attributes {dimension_semantics = [#tpu.dimension_semantics<parallel>], iteration_bounds = array<i64: 1>, scalar_prefetch = 0 : i64, scratch_operands = 0 : i64, tpu.core_type = #tpu.core_type<tc>, window_params = [{transform_indices = @transform_0, window_bounds = array<i64: 8, 128>}, {pipeline_mode = #tpu.pipeline_mode<synchronous>, transform_indices = @transform_1, window_bounds = array<i64: 128, 384>}, {pipeline_mode = #tpu.pipeline_mode<synchronous>, transform_indices = @transform_2, window_bounds = array<i64: 1, 384>}, {transform_indices = @transform_3, window_bounds = array<i64: 8, 384>}]} {
    %c0 = arith.constant 0 : index
    %c0_0 = arith.constant 0 : index
    %0 = vector.load %arg1[%c0, %c0_0] : memref<8x128xbf16, #tpu.memory_space<vmem>>, vector<8x128xbf16>
    %c0_1 = arith.constant 0 : index
    %c0_2 = arith.constant 0 : index
    %1 = vector.load %arg2[%c0_1, %c0_2] : memref<128x384xbf16, #tpu.memory_space<vmem>>, vector<128x384xbf16>
    %cst = arith.constant dense<0.000000e+00> : vector<8x384xf32>
    %2 = tpu.matmul %0, %1, %cst {dimension_numbers = #tpu.dot_dimension_numbers<[1], [0], [0], [1], [0, 0, 1, 1], [], []>} : vector<8x128xbf16>, vector<128x384xbf16>, vector<8x384xf32> -> vector<8x384xf32>
    %c0_3 = arith.constant 0 : index
    %c0_4 = arith.constant 0 : index
    %3 = vector.load %arg3[%c0_3, %c0_4] : memref<1x384xf32, #tpu.memory_space<vmem>>, vector<1x384xf32>
    %4 = vector.broadcast %3 : vector<1x384xf32> to vector<8x384xf32>
    %5 = arith.addf %2, %4 : vector<8x384xf32>
    %cst_5 = arith.constant 5.000000e-01 : f32
    %6 = vector.broadcast %cst_5 : f32 to vector<8x384xf32>
    %7 = arith.mulf %5, %6 : vector<8x384xf32>
    %8 = math.floor %7 : vector<8x384xf32>
    %cst_6 = arith.constant 2.000000e+00 : f32
    %9 = vector.broadcast %cst_6 : f32 to vector<8x384xf32>
    %10 = arith.mulf %9, %8 : vector<8x384xf32>
    %11 = arith.subf %5, %10 : vector<8x384xf32>
    %cst_7 = arith.constant 2.000000e+00 : f32
    %12 = vector.broadcast %cst_7 : f32 to vector<8x384xf32>
    %13 = arith.mulf %12, %11 : vector<8x384xf32>
    %cst_8 = arith.constant 1.000000e+00 : f32
    %14 = vector.broadcast %cst_8 : f32 to vector<8x384xf32>
    %15 = arith.subf %13, %14 : vector<8x384xf32>
    %c0_9 = arith.constant 0 : index
    %c0_10 = arith.constant 0 : index
    %16 = vector.load %arg4[%c0_9, %c0_10] : memref<8x384xf32, #tpu.memory_space<vmem>>, vector<8x384xf32>
    tpu.vector_store %arg4[%c0_9, %c0_10], %15 {strides = array<i32>} : memref<8x384xf32, #tpu.memory_space<vmem>>, vector<8x384xf32>,
    return
  }
  func.func @transform_0(%arg0: i32) -> (i32, i32) {
    %c0_i32 = arith.constant 0 : i32
    %c0_i32_0 = arith.constant 0 : i32
    return %arg0, %c0_i32 : i32, i32
  }
  func.func @transform_1(%arg0: i32) -> (i32, i32) {
    %c0_i32 = arith.constant 0 : i32
    %c0_i32_0 = arith.constant 0 : i32
    %c0_i32_1 = arith.constant 0 : i32
    return %c0_i32, %c0_i32_0 : i32, i32
  }
  func.func @transform_2(%arg0: i32) -> (i32, i32) {
    %c0_i32 = arith.constant 0 : i32
    %c0_i32_0 = arith.constant 0 : i32
    %c0_i32_1 = arith.constant 0 : i32
    return %c0_i32, %c0_i32_0 : i32, i32
  }
  func.func @transform_3(%arg0: i32) -> (i32, i32) {
    %c0_i32 = arith.constant 0 : i32
    %c0_i32_0 = arith.constant 0 : i32
    return %arg0, %c0_i32 : i32, i32
  }
}

</mosaic_0001>

<bundles_post_ra>
// kernel: _run_fused.1
= control target key start
LH: loop header
LB: loop body
LE: loop exit
PB: predicated region body
PF: predicated region fallthrough
CT: control target
= control target key end

     0   :  { %8 = vsyncpa [#allocation3], 0  ;;  %s574_s0 = inlined_call_operand.hbm [shape: bf16[8,128], index: 0, kind: input, shape index: {}]   ;;  %s575_s1 = inlined_call_operand.hbm [shape: bf16[128,384], index: 1, kind: input, shape index: {}]   ;;  %s576_s2 = inlined_call_operand.hbm [shape: f32[1,384], index: 2, kind: input, shape index: {}]   ;;  %s577_s3 = inlined_call_operand.hbm [shape: f32[8,384], index: 3, kind: output, shape index: {}]  }
   0x1   :  { %9 = vsyncpa [#allocation6], 0  ;;  %s26_s14 = sshll.u32 %s575_s1, 4  ;;  %s27_s14 = int_to_ptr.hbm [resolvable:$true] %s26_s14 }
   0x2   :  { %10 = vsyncpa [#allocation4], 0  ;;  %s536_s15 = smov [#allocation5]   ;;  %s16_s19 = sshll.u32 %s574_s0, 4  ;;  %s17_s19 = int_to_ptr.hbm [resolvable:$true] %s16_s19 }
   0x3   :  { %s28_s16 = sshll.u32 %s536_s15, 4  ;;  %s537_s20 = smov 192   ;;  %s29_s16 = int_to_ptr.vmem [resolvable:$true] %s28_s16 }
   0x4   :  { %s538_s21 = smov 12   ;;  %s539_s22 = smov [#allocation2]  }
   0x5   :  { %34 = dma.hbm_to_vmem [thread:$0]  %s27_s14, 3072, %s29_s16, [#allocation6], %s537_s20, %s537_s20, %s538_s21  }
   0x6   :  { %s18_s23 = sshll.u32 %s539_s22, 4  ;;  %s40_s26 = sshll.u32 %s576_s2, 4  ;;  %s19_s23 = int_to_ptr.vmem [resolvable:$true] %s18_s23  ;;  %s41_s26 = int_to_ptr.hbm [resolvable:$true] %s40_s26 }
   0x7   :  { %21 = dma.hbm_to_vmem [thread:$0]  %s17_s19, 64, %s19_s23, [#allocation3]  }
   0x8   :  { %s540_s1 = smov [#allocation7]  }
   0x9   :  { %s42_s27 = sshll.u32 %s540_s1, 4  ;;  %s43_s27 = int_to_ptr.vmem [resolvable:$true] %s42_s27 }
   0xa   :  { %45 = dma.hbm_to_vmem [thread:$0]  %s41_s26, 48, %s43_s27, [#allocation6]  }
   0xb   :  { %530 = dma.done.wait [#allocation3], 64  }
   0xc   :  { %531 = vsyncadd [#allocation3], 4294967232 }
   0xd   :  { %532 = dma.done.wait [#allocation6], 3120  }
   0xe   :  { %533 = vsyncadd [#allocation6], 4294964176  ;;  %v391_v0 = vld [vmem:[#allocation5 + $0xa8] sm:$0xf]  ;;  %v426_v1 = vld [vmem:[#allocation5 + $0xb0] sm:$0xf0] }
   0xf   :  { %v425_v2 = vld [vmem:[#allocation5 + $0xac] sm:$0xf]  ;;  %v392_v3 = vor.u32 %v426_v1, %v391_v0  ;;  %v393_v4 = vld [vmem:[#allocation5 + $0xb4] sm:$0xf0]  ;;  %v399_v5 = vld [vmem:[#allocation5 + $0xb0] sm:$0xf] }
  0x10   :  { %v427_v6 = vld [vmem:[#allocation5 + $0xb8] sm:$0xf0]  ;;  %v396_v7 = vor.u32 %v425_v2, %v393_v4  ;;  %v379_v9 = vld [vmem:[#allocation5 + $0x90] sm:$0xf]  ;;  %v422_v11 = vld [vmem:[#allocation5 + $0x94] sm:$0xf] }
  0x11   :  { %v400_v8 = vor.u32 %v427_v6, %v399_v5  ;;  %v423_v10 = vld [vmem:[#allocation5 + $0x98] sm:$0xf0]  ;;  %227 = vmatpush.bf16.msra.mxu0 %v392_v3  ;;  %v381_v13 = vld [vmem:[#allocation5 + $0x9c] sm:$0xf0]  ;;  %v387_v14 = vld [vmem:[#allocation5 + $0x98] sm:$0xf] }
  0x12   :  { %v380_v12 = vor.u32 %v423_v10, %v379_v9  ;;  %v424_v15 = vld [vmem:[#allocation5 + $0xa0] sm:$0xf0]  ;;  %240 = vmatpush.bf16.msra.mxu1 %v396_v7  ;;  %v384_v16 = vor.u32 %v422_v11, %v381_v13  ;;  %v367_v18 = vld [vmem:[#allocation5 + $0x78] sm:$0xf]  ;;  %v419_v20 = vld [vmem:[#allocation5 + $0x7c] sm:$0xf] }
  0x13   :  { %253 = vmatpush.bf16.msra.mxu2 %v400_v8  ;;  %v388_v17 = vor.u32 %v424_v15, %v387_v14  ;;  %v420_v19 = vld [vmem:[#allocation5 + $0x80] sm:$0xf0]  ;;  %v369_v21 = vld [vmem:[#allocation5 + $0x84] sm:$0xf0]  ;;  %v375_v22 = vld [vmem:[#allocation5 + $0x80] sm:$0xf] }
  0x14   :  { %v421_v23 = vld [vmem:[#allocation5 + $0x88] sm:$0xf0]  ;;  %v368_v24 = vor.u32 %v420_v19, %v367_v18  ;;  %v372_v25 = vor.u32 %v419_v20, %v369_v21  ;;  %v355_v27 = vld [vmem:[#allocation5 + $0x60] sm:$0xf]  ;;  %v416_v29 = vld [vmem:[#allocation5 + $0x64] sm:$0xf] }
  0x15   :  { %228 = vmatpush.bf16.msra.mxu0 %v380_v12  ;;  %v376_v26 = vor.u32 %v421_v23, %v375_v22  ;;  %v417_v28 = vld [vmem:[#allocation5 + $0x68] sm:$0xf0]  ;;  %v357_v30 = vld [vmem:[#allocation5 + $0x6c] sm:$0xf0]  ;;  %v363_v31 = vld [vmem:[#allocation5 + $0x68] sm:$0xf] }
  0x16   :  { %241 = vmatpush.bf16.msra.mxu1 %v384_v16  ;;  %v418_v32 = vld [vmem:[#allocation5 + $0x70] sm:$0xf0]  ;;  %v356_v33 = vor.u32 %v417_v28, %v355_v27  ;;  %v360_v34 = vor.u32 %v416_v29, %v357_v30  ;;  %v343_v36 = vld [vmem:[#allocation5 + $0x48] sm:$0xf]  ;;  %v413_v38 = vld [vmem:[#allocation5 + $0x4c] sm:$0xf] }
  0x17   :  { %254 = vmatpush.bf16.msra.mxu2 %v388_v17  ;;  %v364_v35 = vor.u32 %v418_v32, %v363_v31  ;;  %v414_v37 = vld [vmem:[#allocation5 + $0x50] sm:$0xf0]  ;;  %v345_v39 = vld [vmem:[#allocation5 + $0x54] sm:$0xf0]  ;;  %v351_v40 = vld [vmem:[#allocation5 + $0x50] sm:$0xf] }
  0x18   :  { %v415_v41 = vld [vmem:[#allocation5 + $0x58] sm:$0xf0]  ;;  %v344_v42 = vor.u32 %v414_v37, %v343_v36  ;;  %v348_v43 = vor.u32 %v413_v38, %v345_v39  ;;  %v331_v45 = vld [vmem:[#allocation5 + $0x30] sm:$0xf]  ;;  %v410_v47 = vld [vmem:[#allocation5 + $0x34] sm:$0xf] }
  0x19   :  { %229 = vmatpush.bf16.msra.mxu0 %v368_v24  ;;  %v352_v44 = vor.u32 %v415_v41, %v351_v40  ;;  %v411_v46 = vld [vmem:[#allocation5 + $0x38] sm:$0xf0]  ;;  %v333_v48 = vld [vmem:[#allocation5 + $0x3c] sm:$0xf0]  ;;  %v339_v49 = vld [vmem:[#allocation5 + $0x38] sm:$0xf] }
  0x1a   :  { %242 = vmatpush.bf16.msra.mxu1 %v372_v25  ;;  %v412_v50 = vld [vmem:[#allocation5 + $0x40] sm:$0xf0]  ;;  %v332_v51 = vor.u32 %v411_v46, %v331_v45  ;;  %v336_v52 = vor.u32 %v410_v47, %v333_v48  ;;  %v319_v54 = vld [vmem:[#allocation5 + $0x18] sm:$0xf]  ;;  %v407_v56 = vld [vmem:[#allocation5 + $0x1c] sm:$0xf] }
  0x1b   :  { %255 = vmatpush.bf16.msra.mxu2 %v376_v26  ;;  %v340_v53 = vor.u32 %v412_v50, %v339_v49  ;;  %v408_v55 = vld [vmem:[#allocation5 + $0x20] sm:$0xf0]  ;;  %v321_v57 = vld [vmem:[#allocation5 + $0x24] sm:$0xf0]  ;;  %v327_v58 = vld [vmem:[#allocation5 + $0x20] sm:$0xf] }
  0x1c   :  { %v409_v59 = vld [vmem:[#allocation5 + $0x28] sm:$0xf0]  ;;  %v320_v60 = vor.u32 %v408_v55, %v319_v54  ;;  %v324_v61 = vor.u32 %v407_v56, %v321_v57  ;;  %v307_v63 = vld [vmem:[#allocation5] sm:$0xf]  ;;  %v404_v1 = vld [vmem:[#allocation5 + $0x4] sm:$0xf] }
  0x1d   :  { %230 = vmatpush.bf16.msra.mxu0 %v356_v33  ;;  %v328_v62 = vor.u32 %v409_v59, %v327_v58  ;;  %v405_v0 = vld [vmem:[#allocation5 + $0x8] sm:$0xf0]  ;;  %v309_v2 = vld [vmem:[#allocation5 + $0xc] sm:$0xf0]  ;;  %v315_v3 = vld [vmem:[#allocation5 + $0x8] sm:$0xf] }
  0x1e   :  { %243 = vmatpush.bf16.msra.mxu1 %v360_v34  ;;  %v406_v4 = vld [vmem:[#allocation5 + $0x10] sm:$0xf0]  ;;  %v308_v5 = vor.u32 %v405_v0, %v307_v63  ;;  %v312_v6 = vor.u32 %v404_v1, %v309_v2  ;;  %v58_v8 = vld [vmem:[#allocation2] sm:$0xf]  ;;  %v91_v9 = vld [vmem:[#allocation7] sm:$0x7] }
  0x1f   :  { %256 = vmatpush.bf16.msra.mxu2 %v364_v35  ;;  %v316_v7 = vor.u32 %v406_v4, %v315_v3  ;;  %v93_v10 = vperm.slane %v91_v9, 0  ;;  %v94_v11 = vperm.slane %v91_v9, 1  ;;  %v95_v18 = vperm.slane %v91_v9, 2  ;;  %s541_s0 = smov [#allocation8]   ;;  %s294_s30 = sshll.u32 %s577_s3, 4  ;;  %s295_s30 = int_to_ptr.hbm [resolvable:$true] %s294_s30 }
  0x20   :  { %s292_s2 = sshll.u32 %s541_s0, 4  ;;  %s293_s2 = int_to_ptr.vmem [resolvable:$true] %s292_s2 }
  0x21   :  { %231 = vmatpush.bf16.msra.mxu0 %v344_v42 }
  0x22   :  { %244 = vmatpush.bf16.msra.mxu1 %v348_v43 }
  0x23   :  { %257 = vmatpush.bf16.msra.mxu2 %v352_v44 }
  0x25   :  { %232 = vmatpush.bf16.msra.mxu0 %v332_v51 }
  0x26   :  { %245 = vmatpush.bf16.msra.mxu1 %v336_v52 }
  0x27   :  { %258 = vmatpush.bf16.msra.mxu2 %v340_v53 }
  0x29   :  { %233 = vmatpush.bf16.msra.mxu0 %v320_v60 }
  0x2a   :  { %246 = vmatpush.bf16.msra.mxu1 %v324_v61 }
  0x2b   :  { %259 = vmatpush.bf16.msra.mxu2 %v328_v62 }
  0x2d   :  { %234 = vmatpush.bf16.msra.mxu0 %v308_v5 }
  0x2e   :  { %247 = vmatpush.bf16.msra.mxu1 %v312_v6 }
  0x2f   :  { %260 = vmatpush.bf16.msra.mxu2 %v316_v7 }
  0x30   :  { %235 = vmatmul.bf16.vlgmr.msra.gmra.mxu0 %v58_v8 }
  0x31   :  { %248 = vmatmul.bf16.vlgmr.msra.gmra.mxu1 %v58_v8 }
  0x32   :  { %261 = vmatmul.bf16.vlgmr.msra.gmra.mxu2 %v58_v8 }
  0xad   :  { %v236_v12 = vpop.f32.mrf.mxu0 }
  0xae   :  { %v237_v13 = vadd.f32 %v236_v12, %v93_v10  ;;  %v249_v14 = vpop.f32.mrf.mxu1 }
  0xaf   :  { %v250_v15 = vadd.f32 %v249_v14, %v94_v11 }
  0xb0   :  { %v266_v16 = vmul.f32 0.5, %v237_v13 }
  0xb1   :  { %v267_v17 = vmul.f32 0.5, %v250_v15 }
  0xb2   :  { %v269_v19 = vfloor.f32 %v266_v16 }
  0xb3   :  { %v270_v20 = vfloor.f32 %v267_v17 }
  0xb4   :  { %v272_v21 = vmul.f32 2.0, %v269_v19 }
  0xb5   :  { %v262_v22 = vpop.f32.mrf.mxu2  ;;  %v273_v23 = vmul.f32 2.0, %v270_v20  ;;  %v238_v25 = vpop.f32.mrf.mxu0 }
  0xb6   :  { %v263_v24 = vadd.f32 %v262_v22, %v95_v18  ;;  %v275_v26 = vsub.f32 %v237_v13, %v272_v21  ;;  %v251_v27 = vpop.f32.mrf.mxu1 }
  0xb7   :  { %v276_v28 = vsub.f32 %v250_v15, %v273_v23 }
  0xb8   :  { %v268_v29 = vmul.f32 0.5, %v263_v24  ;;  %v278_v30 = vmul.f32 2.0, %v275_v26 }
  0xb9   :  { %v279_v31 = vmul.f32 2.0, %v276_v28 }
  0xba   :  { %v271_v32 = vfloor.f32 %v268_v29  ;;  %v401_v33 = vadd.f32 -1.0, %v278_v30 }
  0xbb   :  { %v402_v34 = vadd.f32 -1.0, %v279_v31 }
  0xbc   :  { %v274_v35 = vmul.f32 2.0, %v271_v32  ;;  %284 = vst [vmem:[#allocation8] sm:$0xff] %v401_v33 }
  0xbd   :  { %v264_v36 = vpop.f32.mrf.mxu2  ;;  %285 = vst [vmem:[#allocation8 + $0x8] sm:$0xff] %v402_v34 }
  0xbe   :  { %v277_v37 = vsub.f32 %v263_v24, %v274_v35 }
  0xc0   :  { %v280_v38 = vmul.f32 2.0, %v277_v37 }
  0xc2   :  { %v403_v39 = vadd.f32 -1.0, %v280_v38 }
  0xc4   :  { %286 = vst [vmem:[#allocation8 + $0x10] sm:$0xff] %v403_v39 }
  0xc5   :  { %297 = dma.vmem_to_hbm [thread:$0]  %s293_s2, 384, %s295_s30, [#allocation4]  }
  0xc6   :  { %534 = dma.done.wait [#allocation4], 384  }
  0xc7   :  { %535 = vsyncadd [#allocation4], 4294966912 }
  0xc8   :  { %302 = vsyncpa [#allocation3], 1 }
  0xc9   :  { %303 = vsyncpa [#allocation6], 1 }
  0xca   :  { %304 = vsyncpa [#allocation4], 1 }

</bundles_post_ra>
